<compile_context>
chip_gen: v6e
topology: v6e:2x2x1
jax: 0.10.0
libtpu: 0.0.40
codegen_flags: <defaults>
</compile_context>

<pallas_src>
import functools

import jax
import jax.numpy as jnp
from jax.experimental import pallas as pl
from jax.experimental.pallas import tpu as pltpu

_HIDDEN = 100   # fixed by the PyTorch module
_LANE = 128     # TPU lane width


def _round_up(x, m):
    return ((x + m - 1) // m) * m


def _pad2d(a, rows, cols):
    r, c = a.shape
    if r == rows and c == cols:
        return a
    return jnp.pad(a, ((0, rows - r), (0, cols - c)))


def _choose_tile(batch, batch_tile):
    """Pick the batch tile: <= batch (rounded to 8 sublanes), and keep at
    least 2 grid steps for large batches so the parallel grid axis can shard
    across both TensorCores on v7x."""
    t = min(batch_tile, _round_up(batch, 8))
    if (batch + t - 1) // t == 1 and batch >= 1024:
        t = _round_up((batch + 1) // 2, 8)
    return max(t, 8)


def prepare_params(params, compute_dtype=jnp.bfloat16):
    """One-time prep: pad feature dims to lane-dense 128 multiples (x's input
    feature dim K is left un-padded) and cast weights to the compute dtype.
    Biases stay f32 and are added onto the f32 accumulator.

    params = (w1, b1, w2, b2, w3, b3, w4, b4); wN is (in, out), bN is (1, out).
    compute_dtype=None keeps f32 weights (exact path)."""
    w1, b1, w2, b2, w3, b3, w4, b4 = params
    d_in = w1.shape[0]
    d_out = w4.shape[1]
    h_p = _round_up(_HIDDEN, _LANE)
    d_out_p = _round_up(d_out, _LANE)
    wdt = w1.dtype if compute_dtype is None else compute_dtype

    w1p = _pad2d(w1, d_in, h_p).astype(wdt)      # K = d_in stays un-padded
    w2p = _pad2d(w2, h_p, h_p).astype(wdt)
    w3p = _pad2d(w3, h_p, h_p).astype(wdt)
    w4p = _pad2d(w4, h_p, d_out_p).astype(wdt)
    b1p = _pad2d(b1, 1, h_p).astype(jnp.float32)
    b2p = _pad2d(b2, 1, h_p).astype(jnp.float32)
    b3p = _pad2d(b3, 1, h_p).astype(jnp.float32)
    b4p = _pad2d(b4, 1, d_out_p).astype(jnp.float32)
    return (w1p, b1p, w2p, b2p, w3p, b3p, w4p, b4p)


def _mlp_kernel(x_ref,
                w1_ref, b1_ref,
                w2_ref, b2_ref,
                w3_ref, b3_ref,
                w4_ref, b4_ref,
                o_ref):
    """Fused 4-layer MLP on one (batch_tile, d_in) activation slab.
    All matmuls accumulate in f32; activations travel at the weight dtype."""
    # In-kernel cast (VPU, hidden under MXU/DMA slack); x is DMA'd in its
    # original dtype so the wrapper never writes a casted copy to HBM.
    x = x_ref[...].astype(w1_ref.dtype)

    h = jnp.dot(x, w1_ref[...],
                preferred_element_type=jnp.float32) + b1_ref[...]
    h = jnp.maximum(h, 0.0).astype(w2_ref.dtype)

    h = jnp.dot(h, w2_ref[...],
                preferred_element_type=jnp.float32) + b2_ref[...]
    h = jnp.maximum(h, 0.0).astype(w3_ref.dtype)

    h = jnp.dot(h, w3_ref[...],
                preferred_element_type=jnp.float32) + b3_ref[...]
    h = jnp.maximum(h, 0.0).astype(w4_ref.dtype)

    out = jnp.dot(h, w4_ref[...],
                  preferred_element_type=jnp.float32) + b4_ref[...]
    o_ref[...] = out.astype(o_ref.dtype)


@functools.partial(jax.jit, static_argnames=("dim_implicit", "batch_tile"))
def decoupling_forward(x, prepared, dim_implicit, *, batch_tile=1024):
    """x: (B, dim_explicit); prepared: output of prepare_params().
    Returns (B, dim_implicit) in x.dtype."""
    w1p, b1p, w2p, b2p, w3p, b3p, w4p, b4p = prepared
    B, d_in = x.shape
    h_p = w2p.shape[0]
    d_out_p = w4p.shape[1]
    out_dtype = x.dtype

    tile = _choose_tile(B, batch_tile)
    grid = (pl.cdiv(B, tile),)   # partial edge block: rows are independent and
                                 # its output store is masked by Pallas.

    def resident(shape):
        # Constant index_map -> same block every step -> weights/biases stay
        # resident in VMEM across grid steps (no per-step re-DMA).
        return pl.BlockSpec(shape, lambda i: (0,) * len(shape))

    itemsz = jnp.dtype(out_dtype).itemsize
    w_bytes = sum(a.size * a.dtype.itemsize for a in prepared)
    flops = 2 * B * (d_in * h_p + 2 * h_p * h_p + h_p * d_out_p)
    bytes_accessed = (x.size * x.dtype.itemsize + w_bytes + B * d_out_p * itemsz)

    # Scoped-VMEM need (double-buffered x/out blocks + resident weights).
    vmem_need = (2 * (tile * d_in * x.dtype.itemsize + tile * d_out_p * itemsz)
                 + 2 * w_bytes + (2 << 20))
    vmem_limit = vmem_need if vmem_need > (32 << 20) else None

    out_padded = pl.pallas_call(
        _mlp_kernel,
        out_shape=jax.ShapeDtypeStruct((B, d_out_p), out_dtype),
        grid_spec=pltpu.PrefetchScalarGridSpec(
            num_scalar_prefetch=0,
            grid=grid,
            in_specs=[
                # x block: last dim == full array dim (legal, no 128 padding).
                pl.BlockSpec((tile, d_in), lambda i: (i, 0)),
                resident(w1p.shape), resident(b1p.shape),
                resident(w2p.shape), resident(b2p.shape),
                resident(w3p.shape), resident(b3p.shape),
                resident(w4p.shape), resident(b4p.shape),
            ],
            out_specs=pl.BlockSpec((tile, d_out_p), lambda i: (i, 0)),
        ),
        compiler_params=pltpu.CompilerParams(
            # Batch axis is independent -> shards across the 2 TCs on v7x.
            dimension_semantics=("parallel",),
            vmem_limit_bytes=vmem_limit),
        cost_estimate=pl.CostEstimate(
            flops=flops, transcendentals=0, bytes_accessed=bytes_accessed),
    )(x, w1p, b1p, w2p, b2p, w3p, b3p, w4p, b4p)

    # Feature-padding slice only (no batch padding to undo); fuses under jit.
    return out_padded[:, :dim_implicit]


def init_params(key, dim_explicit, dim_implicit, hidden=_HIDDEN, dtype=jnp.float32):
    """Deterministic init mimicking PyTorch Linear's U(-1/sqrt(in), 1/sqrt(in)).
    Weights stored as (in, out); biases as (1, out)."""
    dims = [(dim_explicit, hidden), (hidden, hidden),
            (hidden, hidden), (hidden, dim_implicit)]
    params = []
    for fan_in, fan_out in dims:
        key, kw, kb = jax.random.split(key, 3)
        bound = 1.0 / (fan_in ** 0.5)
        w = jax.random.uniform(kw, (fan_in, fan_out), dtype, minval=-bound, maxval=bound)
        b = jax.random.uniform(kb, (1, fan_out), dtype, minval=-bound, maxval=bound)
        params.extend([w, b])
    return tuple(params)


def reference_forward(x, params):
    """Pure-JAX reference for validation."""
    w1, b1, w2, b2, w3, b3, w4, b4 = params
    h = jnp.maximum(x @ w1 + b1, 0.0)
    h = jnp.maximum(h @ w2 + b2, 0.0)
    h = jnp.maximum(h @ w3 + b3, 0.0)
    return h @ w4 + b4


if __name__ == "__main__":
    key = jax.random.PRNGKey(0)
    dim_explicit, dim_implicit = 32, 16

    kx, kp, kx2 = jax.random.split(key, 3)
    params = init_params(kp, dim_explicit, dim_implicit)

    # --- exact f32 path, small batch (single tile, tile capped to 8 rows) ---
    prepared_f32 = prepare_params(params, compute_dtype=None)
    x_small = jax.random.normal(kx, (8, dim_explicit), jnp.float32)
    out_small = jax.block_until_ready(
        decoupling_forward(x_small, prepared_f32, dim_implicit))
    ref_small = reference_forward(x_small, params)
    assert out_small.shape == (8, dim_implicit)
    assert jnp.allclose(out_small, ref_small, atol=1e-4, rtol=1e-4), \
        "f32 small-batch mismatch vs reference"

    # --- exact f32 path, ragged batch (partial edge block, 2-step grid) ---
    x_big = jax.random.normal(kx2, (1030, dim_explicit), jnp.float32)
    out_big = jax.block_until_ready(
        decoupling_forward(x_big, prepared_f32, dim_implicit))
    ref_big = reference_forward(x_big, params)
    assert out_big.shape == (1030, dim_implicit)
    assert jnp.allclose(out_big, ref_big, atol=1e-4, rtol=1e-4), \
        "f32 ragged-batch mismatch vs reference"

    # --- default bf16 compute path (v6e/v7x fast path), f32 accumulation ---
    # bf16 operands change numerics at ~1e-2 level; tolerance documented here.
    prepared_bf16 = prepare_params(params)   # bf16 weights by default
    out_bf16 = jax.block_until_ready(
        decoupling_forward(x_big, prepared_bf16, dim_implicit))
    assert out_bf16.shape == (1030, dim_implicit)
    assert jnp.allclose(out_bf16, ref_big, atol=1e-1, rtol=1e-1), \
        "bf16 path diverged too far from f32 reference"

    print("KERNEL_OK")
</pallas_src>

<mosaic_0001>
module attributes {stable_mosaic.version = 11 : i64} {
  func.func @_mlp_kernel(%arg0: i32, %arg1: memref<8x32xf32, #tpu.memory_space<vmem>>, %arg2: memref<32x128xf32, #tpu.memory_space<vmem>>, %arg3: memref<1x128xf32, #tpu.memory_space<vmem>>, %arg4: memref<128x128xf32, #tpu.memory_space<vmem>>, %arg5: memref<1x128xf32, #tpu.memory_space<vmem>>, %arg6: memref<128x128xf32, #tpu.memory_space<vmem>>, %arg7: memref<1x128xf32, #tpu.memory_space<vmem>>, %arg8: memref<128x128xf32, #tpu.memory_space<vmem>>, %arg9: memref<1x128xf32, #tpu.memory_space<vmem>>, %arg10: memref<8x128xf32, #tpu.memory_space<vmem>>) attributes {dimension_semantics = [#tpu.dimension_semantics<parallel>], iteration_bounds = array<i64: 1>, scalar_prefetch = 0 : i64, scratch_operands = 0 : i64, tpu.core_type = #tpu.core_type<tc>, window_params = [{transform_indices = @transform_0, window_bounds = array<i64: 8, 32>}, {pipeline_mode = #tpu.pipeline_mode<synchronous>, transform_indices = @transform_1, window_bounds = array<i64: 32, 128>}, {pipeline_mode = #tpu.pipeline_mode<synchronous>, transform_indices = @transform_2, window_bounds = array<i64: 1, 128>}, {pipeline_mode = #tpu.pipeline_mode<synchronous>, transform_indices = @transform_3, window_bounds = array<i64: 128, 128>}, {pipeline_mode = #tpu.pipeline_mode<synchronous>, transform_indices = @transform_4, window_bounds = array<i64: 1, 128>}, {pipeline_mode = #tpu.pipeline_mode<synchronous>, transform_indices = @transform_5, window_bounds = array<i64: 128, 128>}, {pipeline_mode = #tpu.pipeline_mode<synchronous>, transform_indices = @transform_6, window_bounds = array<i64: 1, 128>}, {pipeline_mode = #tpu.pipeline_mode<synchronous>, transform_indices = @transform_7, window_bounds = array<i64: 128, 128>}, {pipeline_mode = #tpu.pipeline_mode<synchronous>, transform_indices = @transform_8, window_bounds = array<i64: 1, 128>}, {transform_indices = @transform_9, window_bounds = array<i64: 8, 128>}]} {
    %c0 = arith.constant 0 : index
    %c0_0 = arith.constant 0 : index
    %0 = vector.load %arg1[%c0, %c0_0] : memref<8x32xf32, #tpu.memory_space<vmem>>, vector<8x32xf32>
    %c0_1 = arith.constant 0 : index
    %c0_2 = arith.constant 0 : index
    %1 = vector.load %arg2[%c0_1, %c0_2] : memref<32x128xf32, #tpu.memory_space<vmem>>, vector<32x128xf32>
    %cst = arith.constant dense<0.000000e+00> : vector<8x128xf32>
    %2 = tpu.matmul %0, %1, %cst {dimension_numbers = #tpu.dot_dimension_numbers<[1], [0], [0], [1], [0, 0, 1, 1], [], []>} : vector<8x32xf32>, vector<32x128xf32>, vector<8x128xf32> -> vector<8x128xf32>
    %c0_3 = arith.constant 0 : index
    %c0_4 = arith.constant 0 : index
    %3 = vector.load %arg3[%c0_3, %c0_4] : memref<1x128xf32, #tpu.memory_space<vmem>>, vector<1x128xf32>
    %4 = vector.broadcast %3 : vector<1x128xf32> to vector<8x128xf32>
    %5 = arith.addf %2, %4 : vector<8x128xf32>
    %cst_5 = arith.constant 0.000000e+00 : f32
    %6 = vector.broadcast %cst_5 : f32 to vector<8x128xf32>
    %7 = arith.maximumf %5, %6 : vector<8x128xf32>
    %c0_6 = arith.constant 0 : index
    %c0_7 = arith.constant 0 : index
    %8 = vector.load %arg4[%c0_6, %c0_7] : memref<128x128xf32, #tpu.memory_space<vmem>>, vector<128x128xf32>
    %cst_8 = arith.constant dense<0.000000e+00> : vector<8x128xf32>
    %9 = tpu.matmul %7, %8, %cst_8 {dimension_numbers = #tpu.dot_dimension_numbers<[1], [0], [0], [1], [0, 0, 1, 1], [], []>} : vector<8x128xf32>, vector<128x128xf32>, vector<8x128xf32> -> vector<8x128xf32>
    %c0_9 = arith.constant 0 : index
    %c0_10 = arith.constant 0 : index
    %10 = vector.load %arg5[%c0_9, %c0_10] : memref<1x128xf32, #tpu.memory_space<vmem>>, vector<1x128xf32>
    %11 = vector.broadcast %10 : vector<1x128xf32> to vector<8x128xf32>
    %12 = arith.addf %9, %11 : vector<8x128xf32>
    %cst_11 = arith.constant 0.000000e+00 : f32
    %13 = vector.broadcast %cst_11 : f32 to vector<8x128xf32>
    %14 = arith.maximumf %12, %13 : vector<8x128xf32>
    %c0_12 = arith.constant 0 : index
    %c0_13 = arith.constant 0 : index
    %15 = vector.load %arg6[%c0_12, %c0_13] : memref<128x128xf32, #tpu.memory_space<vmem>>, vector<128x128xf32>
    %cst_14 = arith.constant dense<0.000000e+00> : vector<8x128xf32>
    %16 = tpu.matmul %14, %15, %cst_14 {dimension_numbers = #tpu.dot_dimension_numbers<[1], [0], [0], [1], [0, 0, 1, 1], [], []>} : vector<8x128xf32>, vector<128x128xf32>, vector<8x128xf32> -> vector<8x128xf32>
    %c0_15 = arith.constant 0 : index
    %c0_16 = arith.constant 0 : index
    %17 = vector.load %arg7[%c0_15, %c0_16] : memref<1x128xf32, #tpu.memory_space<vmem>>, vector<1x128xf32>
    %18 = vector.broadcast %17 : vector<1x128xf32> to vector<8x128xf32>
    %19 = arith.addf %16, %18 : vector<8x128xf32>
    %cst_17 = arith.constant 0.000000e+00 : f32
    %20 = vector.broadcast %cst_17 : f32 to vector<8x128xf32>
    %21 = arith.maximumf %19, %20 : vector<8x128xf32>
    %c0_18 = arith.constant 0 : index
    %c0_19 = arith.constant 0 : index
    %22 = vector.load %arg8[%c0_18, %c0_19] : memref<128x128xf32, #tpu.memory_space<vmem>>, vector<128x128xf32>
    %cst_20 = arith.constant dense<0.000000e+00> : vector<8x128xf32>
    %23 = tpu.matmul %21, %22, %cst_20 {dimension_numbers = #tpu.dot_dimension_numbers<[1], [0], [0], [1], [0, 0, 1, 1], [], []>} : vector<8x128xf32>, vector<128x128xf32>, vector<8x128xf32> -> vector<8x128xf32>
    %c0_21 = arith.constant 0 : index
    %c0_22 = arith.constant 0 : index
    %24 = vector.load %arg9[%c0_21, %c0_22] : memref<1x128xf32, #tpu.memory_space<vmem>>, vector<1x128xf32>
    %25 = vector.broadcast %24 : vector<1x128xf32> to vector<8x128xf32>
    %26 = arith.addf %23, %25 : vector<8x128xf32>
    %c0_23 = arith.constant 0 : index
    %c0_24 = arith.constant 0 : index
    %27 = vector.load %arg10[%c0_23, %c0_24] : memref<8x128xf32, #tpu.memory_space<vmem>>, vector<8x128xf32>
    tpu.vector_store %arg10[%c0_23, %c0_24], %26 {strides = array<i32>} : memref<8x128xf32, #tpu.memory_space<vmem>>, vector<8x128xf32>,
    return
  }
  func.func @transform_0(%arg0: i32) -> (i32, i32) {
    %c0_i32 = arith.constant 0 : i32
    %c0_i32_0 = arith.constant 0 : i32
    return %arg0, %c0_i32 : i32, i32
  }
  func.func @transform_1(%arg0: i32) -> (i32, i32) {
    %c0_i32 = arith.constant 0 : i32
    %c0_i32_0 = arith.constant 0 : i32
    %c0_i32_1 = arith.constant 0 : i32
    return %c0_i32, %c0_i32_0 : i32, i32
  }
  func.func @transform_2(%arg0: i32) -> (i32, i32) {
    %c0_i32 = arith.constant 0 : i32
    %c0_i32_0 = arith.constant 0 : i32
    %c0_i32_1 = arith.constant 0 : i32
    return %c0_i32, %c0_i32_0 : i32, i32
  }
  func.func @transform_3(%arg0: i32) -> (i32, i32) {
    %c0_i32 = arith.constant 0 : i32
    %c0_i32_0 = arith.constant 0 : i32
    %c0_i32_1 = arith.constant 0 : i32
    return %c0_i32, %c0_i32_0 : i32, i32
  }
  func.func @transform_4(%arg0: i32) -> (i32, i32) {
    %c0_i32 = arith.constant 0 : i32
    %c0_i32_0 = arith.constant 0 : i32
    %c0_i32_1 = arith.constant 0 : i32
    return %c0_i32, %c0_i32_0 : i32, i32
  }
  func.func @transform_5(%arg0: i32) -> (i32, i32) {
    %c0_i32 = arith.constant 0 : i32
    %c0_i32_0 = arith.constant 0 : i32
    %c0_i32_1 = arith.constant 0 : i32
    return %c0_i32, %c0_i32_0 : i32, i32
  }
  func.func @transform_6(%arg0: i32) -> (i32, i32) {
    %c0_i32 = arith.constant 0 : i32
    %c0_i32_0 = arith.constant 0 : i32
    %c0_i32_1 = arith.constant 0 : i32
    return %c0_i32, %c0_i32_0 : i32, i32
  }
  func.func @transform_7(%arg0: i32) -> (i32, i32) {
    %c0_i32 = arith.constant 0 : i32
    %c0_i32_0 = arith.constant 0 : i32
    %c0_i32_1 = arith.constant 0 : i32
    return %c0_i32, %c0_i32_0 : i32, i32
  }
  func.func @transform_8(%arg0: i32) -> (i32, i32) {
    %c0_i32 = arith.constant 0 : i32
    %c0_i32_0 = arith.constant 0 : i32
    %c0_i32_1 = arith.constant 0 : i32
    return %c0_i32, %c0_i32_0 : i32, i32
  }
  func.func @transform_9(%arg0: i32) -> (i32, i32) {
    %c0_i32 = arith.constant 0 : i32
    %c0_i32_0 = arith.constant 0 : i32
    return %arg0, %c0_i32 : i32, i32
  }
}

</mosaic_0001>

<bundles_post_ra>
// kernel: decoupling_forward.1
= control target key start
LH: loop header
LB: loop body
LE: loop exit
PB: predicated region body
PF: predicated region fallthrough
CT: control target
= control target key end

     0   :  { %14 = vsyncpa [#allocation3], 0  ;;  %s962_s0 = inlined_call_operand.hbm [shape: f32[8,32], index: 0, kind: input, shape index: {}]   ;;  %s963_s1 = inlined_call_operand.hbm [shape: f32[32,128], index: 1, kind: input, shape index: {}]   ;;  %s964_s2 = inlined_call_operand.vmem [shape: f32[1,128], index: 2, kind: input, shape index: {}]   ;;  %s965_s3 = inlined_call_operand.hbm [shape: f32[128,128], index: 3, kind: input, shape index: {}]   ;;  %s966_s4 = inlined_call_operand.vmem [shape: f32[1,128], index: 4, kind: input, shape index: {}]   ;;  %s967_s5 = inlined_call_operand.hbm [shape: f32[128,128], index: 5, kind: input, shape index: {}]   ;;  %s968_s6 = inlined_call_operand.vmem [shape: f32[1,128], index: 6, kind: input, shape index: {}]   ;;  %s969_s7 = inlined_call_operand.hbm [shape: f32[128,128], index: 7, kind: input, shape index: {}]   ;;  %s970_s8 = inlined_call_operand.vmem [shape: f32[1,128], index: 8, kind: input, shape index: {}]   ;;  %s971_s9 = inlined_call_operand.hbm [shape: f32[8,128], index: 9, kind: output, shape index: {}]  }
   0x1   :  { %15 = vsyncpa [#allocation6], 0 }
   0x2   :  { %16 = vsyncpa [#allocation9], 0 }
   0x3   :  { %17 = vsyncpa [#allocation4], 0  ;;  %s800_s30 = smov [#allocation5]  }
   0x4   :  { %s33_s10 = sshll.u32 %s800_s30, 4  ;;  %s34_s10 = int_to_ptr.vmem [resolvable:$true] %s33_s10 }
   0x5   :  { %s680_s11 = scalar_lea.vmem %s34_s10, 512  ;;  %p685_p1 = scmp.lt.s32.totalorder %s34_s10, %s34_s10 }
   0x6   :  { %p681_p0 = scmp.ne.s32.totalorder %s34_s10, %s680_s11  ;;  %p686_p2 = scmp.lt.s32.totalorder %s680_s11, %s680_s11 }
   0x8   :  { %p687_p3 = por %p686_p2, %p685_p1 }
   0xa   :  { %p688_p4 = pnand %p687_p3, %p681_p0 }
   0xc   :  { %691 = shalt.err (!%p688_p4)
}
   0xd   :  { %s801_s12 = smov 128   ;;  %s802_s13 = smov 8  }
   0xe   :  { %39 = dma.hbm_to_vmem [thread:$0]  %s963_s1, 512, %s34_s10, [#allocation6], %s801_s12, %s801_s12, %s802_s13  }
   0xf   :  { %s803_s16 = smov [#allocation8]   ;;  %s804_s18 = smov [#allocation2]  }
  0x10   :  { %s61_s17 = sshll.u32 %s803_s16, 4  ;;  %s24_s19 = sshll.u32 %s804_s18, 4  ;;  %s62_s17 = int_to_ptr.vmem [resolvable:$true] %s61_s17  ;;  %s25_s19 = int_to_ptr.vmem [resolvable:$true] %s24_s19 }
  0x11   :  { %s700_s20 = scalar_lea.vmem %s62_s17, 2048  ;;  %p705_p6 = scmp.lt.s32.totalorder %s62_s17, %s62_s17 }
  0x12   :  { %p701_p5 = scmp.ne.s32.totalorder %s62_s17, %s700_s20  ;;  %p706_p7 = scmp.lt.s32.totalorder %s700_s20, %s700_s20 }
  0x14   :  { %p707_p8 = por %p706_p7, %p705_p6 }
  0x16   :  { %p708_p9 = pnand %p707_p8, %p701_p5 }
  0x18   :  { %711 = shalt.err (!%p708_p9)
}
  0x19   :  { %67 = dma.hbm_to_vmem [thread:$0]  %s967_s5, 2048, %s62_s17, [#allocation9], %s801_s12, %s801_s12, %s802_s13  }
  0x1a   :  { %s720_s1 = scalar_lea.vmem %s25_s19, 128  ;;  %p725_p11 = scmp.lt.s32.totalorder %s25_s19, %s25_s19 }
  0x1b   :  { %p721_p10 = scmp.ne.s32.totalorder %s25_s19, %s720_s1  ;;  %p726_p12 = scmp.lt.s32.totalorder %s720_s1, %s720_s1 }
  0x1d   :  { %p727_p13 = por %p726_p12, %p725_p11 }
  0x1f   :  { %p728_p0 = pnand %p727_p13, %p721_p10 }
  0x21   :  { %731 = shalt.err (!%p728_p0)
}
  0x22   :  { %27 = dma.hbm_to_vmem [thread:$0]  %s962_s0, 128, %s25_s19, [#allocation3]  }
  0x23   :  { %s805_s25 = smov [#allocation7]   ;;  %s806_s27 = smov [#allocation10]  }
  0x24   :  { %s47_s26 = sshll.u32 %s805_s25, 4  ;;  %s75_s28 = sshll.u32 %s806_s27, 4  ;;  %s48_s26 = int_to_ptr.vmem [resolvable:$true] %s47_s26  ;;  %s76_s28 = int_to_ptr.vmem [resolvable:$true] %s75_s28 }
  0x25   :  { %s740_s29 = scalar_lea.vmem %s48_s26, 2048  ;;  %p745_p2 = scmp.lt.s32.totalorder %s48_s26, %s48_s26 }
  0x26   :  { %p741_p1 = scmp.ne.s32.totalorder %s48_s26, %s740_s29  ;;  %p746_p3 = scmp.lt.s32.totalorder %s740_s29, %s740_s29 }
  0x28   :  { %p747_p4 = por %p746_p3, %p745_p2 }
  0x2a   :  { %p748_p5 = pnand %p747_p4, %p741_p1 }
  0x2c   :  { %751 = shalt.err (!%p748_p5)
}
  0x2d   :  { %53 = dma.hbm_to_vmem [thread:$0]  %s965_s3, 2048, %s48_s26, [#allocation6], %s801_s12, %s801_s12, %s802_s13  }
  0x2e   :  { %s760_s0 = scalar_lea.vmem %s76_s28, 2048  ;;  %p765_p7 = scmp.lt.s32.totalorder %s76_s28, %s76_s28 }
  0x2f   :  { %p761_p6 = scmp.ne.s32.totalorder %s76_s28, %s760_s0  ;;  %p766_p8 = scmp.lt.s32.totalorder %s760_s0, %s760_s0 }
  0x31   :  { %p767_p9 = por %p766_p8, %p765_p7 }
  0x33   :  { %p768_p10 = pnand %p767_p9, %p761_p6 }
  0x35   :  { %771 = shalt.err (!%p768_p10)
}
  0x36   :  { %81 = dma.hbm_to_vmem [thread:$0]  %s969_s7, 2048, %s76_s28, [#allocation9], %s801_s12, %s801_s12, %s802_s13  }
  0x37   :  { %792 = dma.done.wait [#allocation3], 128  }
  0x38   :  { %793 = vsyncadd [#allocation3], 4294967168 }
  0x39   :  { %794 = dma.done.wait [#allocation6], 2560  }
  0x3a   :  { %795 = vsyncadd [#allocation6], 4294964736 }
  0x3b   :  { %796 = dma.done.wait [#allocation9], 4096  }
  0x3c   :  { %797 = vsyncadd [#allocation9], 4294963200  ;;  %v807_v0 = vmov 0.0   ;;  %vm808_vm0 = vmmov 0   ;;  %v103_v1 = vld [vmem:[#allocation5 + $0x18] sm:$0xff]  ;;  %v102_v2 = vld [vmem:[#allocation5 + $0x10] sm:$0xff] }
  0x3d   :  { %546 = vmatprep.subr.mxu0 %v807_v0  ;;  %554 = vmatprep.mubr.msk.f32.mxu0 %vm808_vm0, %v807_v0  ;;  %v201_v3 = vld [vmem:[#allocation7 + $0x78] sm:$0xff]  ;;  %v101_v4 = vld [vmem:[#allocation5 + $0x8] sm:$0xff]  ;;  %v200_v5 = vld [vmem:[#allocation7 + $0x70] sm:$0xff]  ;;  %vm111_vm1 = vcmask 261120   ;;  %s809_s16 = smov [#allocation11]  }
  0x3e   :  { %557 = vmatprep.subr.mxu1 %v807_v0  ;;  %589 = vmatprep.mubr.msk.f32.mxu1 %vm808_vm0, %v807_v0  ;;  %v199_v6 = vld [vmem:[#allocation7 + $0x68] sm:$0xff]  ;;  %v100_v7 = vld [vmem:[#allocation5] sm:$0xff]  ;;  %v99_v8 = vld [vmem:[#allocation2] sm:$0xff]  ;;  %s474_s17 = sshll.u32 %s809_s16, 4  ;;  %s475_s17 = int_to_ptr.vmem [resolvable:$true] %s474_s17 }
  0x3f   :  { %547 = vmatpush3.msra.mxu0 %v103_v1  ;;  %558 = vmatpush3.msra.mxu1 %v201_v3  ;;  %v198_v9 = vld [vmem:[#allocation7 + $0x60] sm:$0xff]  ;;  %v197_v10 = vld [vmem:[#allocation7 + $0x58] sm:$0xff]  ;;  %v196_v11 = vld [vmem:[#allocation7 + $0x50] sm:$0xff]  ;;  %s772_s18 = scalar_lea.vmem %s475_s17, 128  ;;  %p777_p12 = scmp.lt.s32.totalorder %s475_s17, %s475_s17 }
  0x40   :  { %548 = vmatprep.subr.mxu0 %v807_v0  ;;  %559 = vmatprep.subr.mxu1 %v807_v0  ;;  %v195_v12 = vld [vmem:[#allocation7 + $0x48] sm:$0xff]  ;;  %v194_v13 = vld [vmem:[#allocation7 + $0x40] sm:$0xff]  ;;  %v193_v14 = vld [vmem:[#allocation7 + $0x38] sm:$0xff]  ;;  %p773_p11 = scmp.ne.s32.totalorder %s475_s17, %s772_s18  ;;  %p778_p13 = scmp.lt.s32.totalorder %s772_s18, %s772_s18 }
  0x41   :  { %549 = vmatpush3.msra.mxu0 %v102_v2  ;;  %560 = vmatpush3.msra.mxu1 %v200_v5  ;;  %v192_v15 = vld [vmem:[#allocation7 + $0x30] sm:$0xff]  ;;  %v191_v16 = vld [vmem:[#allocation7 + $0x28] sm:$0xff]  ;;  %v190_v17 = vld [vmem:[#allocation7 + $0x20] sm:$0xff] }
  0x42   :  { %550 = vmatprep.subr.mxu0 %v807_v0  ;;  %561 = vmatprep.subr.mxu1 %v807_v0  ;;  %v189_v18 = vld [vmem:[#allocation7 + $0x18] sm:$0xff]  ;;  %v188_v19 = vld [vmem:[#allocation7 + $0x10] sm:$0xff]  ;;  %v187_v20 = vld [vmem:[#allocation7 + $0x8] sm:$0xff]  ;;  %p779_p0 = por %p778_p13, %p777_p12 }
  0x43   :  { %551 = vmatpush3.msra.mxu0 %v101_v4  ;;  %562 = vmatpush3.msra.mxu1 %v199_v6  ;;  %v186_v21 = vld [vmem:[#allocation7] sm:$0xff]  ;;  %v295_v22 = vld [vmem:[#allocation8 + $0x78] sm:$0xff]  ;;  %v294_v23 = vld [vmem:[#allocation8 + $0x70] sm:$0xff] }
  0x44   :  { %552 = vmatprep.subr.mxu0 %v807_v0  ;;  %563 = vmatprep.subr.mxu1 %v807_v0  ;;  %v293_v24 = vld [vmem:[#allocation8 + $0x68] sm:$0xff]  ;;  %v292_v25 = vld [vmem:[#allocation8 + $0x60] sm:$0xff]  ;;  %v291_v26 = vld [vmem:[#allocation8 + $0x58] sm:$0xff]  ;;  %p780_p1 = pnand %p779_p0, %p773_p11 }
  0x45   :  { %553 = vmatpush3.msra.mxu0 %v100_v7  ;;  %564 = vmatpush3.msra.mxu1 %v198_v9  ;;  %v290_v27 = vld [vmem:[#allocation8 + $0x50] sm:$0xff]  ;;  %v289_v28 = vld [vmem:[#allocation8 + $0x48] sm:$0xff]  ;;  %v288_v29 = vld [vmem:[#allocation8 + $0x40] sm:$0xff] }
  0x46   :  { %555 = vmatmul.mubr.msk.f32.vlgmr.msra.gmra.mxu0 %vm111_vm1, %v99_v8  ;;  %565 = vmatprep.subr.mxu1 %v807_v0  ;;  %v287_v30 = vld [vmem:[#allocation8 + $0x38] sm:$0xff]  ;;  %v286_v31 = vld [vmem:[#allocation8 + $0x30] sm:$0xff]  ;;  %v285_v32 = vld [vmem:[#allocation8 + $0x28] sm:$0xff] }
  0x47   :  { %592 = vmatprep.subr.mxu0 %v807_v0  ;;  %566 = vmatpush3.msra.mxu1 %v197_v10  ;;  %v284_v33 = vld [vmem:[#allocation8 + $0x20] sm:$0xff]  ;;  %v283_v34 = vld [vmem:[#allocation8 + $0x18] sm:$0xff]  ;;  %v282_v40 = vld [vmem:[#allocation8 + $0x10] sm:$0xff] }
  0x48   :  { %624 = vmatprep.mubr.msk.f32.mxu0 %vm808_vm0, %v807_v0  ;;  %567 = vmatprep.subr.mxu1 %v807_v0  ;;  %v485_v35 = vld [vmem:[%s964_s2] ss:$0 sm:$0xff]  ;;  %v281_v41 = vld [vmem:[#allocation8 + $0x8] sm:$0xff]  ;;  %v280_v42 = vld [vmem:[#allocation8] sm:$0xff] }
  0x49   :  { %568 = vmatpush3.msra.mxu1 %v196_v11  ;;  %593 = vmatpush3.msra.mxu0 %v295_v22  ;;  %v389_v43 = vld [vmem:[#allocation10 + $0x78] sm:$0xff]  ;;  %v388_v44 = vld [vmem:[#allocation10 + $0x70] sm:$0xff]  ;;  %v387_v45 = vld [vmem:[#allocation10 + $0x68] sm:$0xff] }
  0x4a   :  { %569 = vmatprep.subr.mxu1 %v807_v0  ;;  %594 = vmatprep.subr.mxu0 %v807_v0  ;;  %v386_v46 = vld [vmem:[#allocation10 + $0x60] sm:$0xff]  ;;  %v385_v47 = vld [vmem:[#allocation10 + $0x58] sm:$0xff]  ;;  %v384_v48 = vld [vmem:[#allocation10 + $0x50] sm:$0xff] }
  0x4b   :  { %570 = vmatpush3.msra.mxu1 %v195_v12  ;;  %595 = vmatpush3.msra.mxu0 %v294_v23  ;;  %v383_v49 = vld [vmem:[#allocation10 + $0x48] sm:$0xff]  ;;  %v382_v50 = vld [vmem:[#allocation10 + $0x40] sm:$0xff]  ;;  %v381_v51 = vld [vmem:[#allocation10 + $0x38] sm:$0xff] }
  0x4c   :  { %571 = vmatprep.subr.mxu1 %v807_v0  ;;  %596 = vmatprep.subr.mxu0 %v807_v0  ;;  %v380_v52 = vld [vmem:[#allocation10 + $0x30] sm:$0xff]  ;;  %v379_v53 = vld [vmem:[#allocation10 + $0x28] sm:$0xff]  ;;  %v378_v54 = vld [vmem:[#allocation10 + $0x20] sm:$0xff] }
  0x4d   :  { %572 = vmatpush3.msra.mxu1 %v194_v13  ;;  %597 = vmatpush3.msra.mxu0 %v293_v24  ;;  %v377_v55 = vld [vmem:[#allocation10 + $0x18] sm:$0xff]  ;;  %v376_v61 = vld [vmem:[#allocation10 + $0x10] sm:$0xff]  ;;  %v375_v62 = vld [vmem:[#allocation10 + $0x8] sm:$0xff] }
  0x4e   :  { %573 = vmatprep.subr.mxu1 %v807_v0  ;;  %598 = vmatprep.subr.mxu0 %v807_v0  ;;  %v487_v56 = vld [vmem:[%s966_s4] ss:$0 sm:$0xff]  ;;  %v374_v63 = vld [vmem:[#allocation10] sm:$0xff] }
  0x4f   :  { %574 = vmatpush3.msra.mxu1 %v193_v14  ;;  %599 = vmatpush3.msra.mxu0 %v292_v25  ;;  %v488_v1 = vld [vmem:[%s968_s6] ss:$0 sm:$0xff] }
  0x50   :  { %575 = vmatprep.subr.mxu1 %v807_v0  ;;  %600 = vmatprep.subr.mxu0 %v807_v0  ;;  %v489_v6 = vld [vmem:[%s970_s8] ss:$0 sm:$0xff] }
  0x51   :  { %576 = vmatpush3.msra.mxu1 %v192_v15  ;;  %601 = vmatpush3.msra.mxu0 %v291_v26 }
  0x52   :  { %577 = vmatprep.subr.mxu1 %v807_v0  ;;  %602 = vmatprep.subr.mxu0 %v807_v0 }
  0x53   :  { %578 = vmatpush3.msra.mxu1 %v191_v16  ;;  %603 = vmatpush3.msra.mxu0 %v290_v27 }
  0x54   :  { %579 = vmatprep.subr.mxu1 %v807_v0  ;;  %604 = vmatprep.subr.mxu0 %v807_v0 }
  0x55   :  { %580 = vmatpush3.msra.mxu1 %v190_v17  ;;  %605 = vmatpush3.msra.mxu0 %v289_v28 }
  0x56   :  { %581 = vmatprep.subr.mxu1 %v807_v0  ;;  %606 = vmatprep.subr.mxu0 %v807_v0 }
  0x57   :  { %582 = vmatpush3.msra.mxu1 %v189_v18  ;;  %607 = vmatpush3.msra.mxu0 %v288_v29 }
  0x58   :  { %583 = vmatprep.subr.mxu1 %v807_v0  ;;  %608 = vmatprep.subr.mxu0 %v807_v0 }
  0x59   :  { %584 = vmatpush3.msra.mxu1 %v188_v19  ;;  %609 = vmatpush3.msra.mxu0 %v287_v30 }
  0x5a   :  { %585 = vmatprep.subr.mxu1 %v807_v0  ;;  %610 = vmatprep.subr.mxu0 %v807_v0 }
  0x5b   :  { %586 = vmatpush3.msra.mxu1 %v187_v20  ;;  %611 = vmatpush3.msra.mxu0 %v286_v31 }
  0x5c   :  { %587 = vmatprep.subr.mxu1 %v807_v0  ;;  %612 = vmatprep.subr.mxu0 %v807_v0 }
  0x5d   :  { %588 = vmatpush3.msra.mxu1 %v186_v21  ;;  %613 = vmatpush3.msra.mxu0 %v285_v32 }
  0x5e   :  { %627 = vmatprep.subr.mxu1 %v807_v0  ;;  %614 = vmatprep.subr.mxu0 %v807_v0 }
  0x5f   :  { %615 = vmatpush3.msra.mxu0 %v284_v33 }
  0x60   :  { %616 = vmatprep.subr.mxu0 %v807_v0 }
  0x61   :  { %617 = vmatpush3.msra.mxu0 %v283_v34 }
  0x62   :  { %618 = vmatprep.subr.mxu0 %v807_v0 }
  0x63   :  { %619 = vmatpush3.msra.mxu0 %v282_v40 }
  0x64   :  { %620 = vmatprep.subr.mxu0 %v807_v0 }
  0x65   :  { %621 = vmatpush3.msra.mxu0 %v281_v41 }
  0x66   :  { %622 = vmatprep.subr.mxu0 %v807_v0 }
  0x67   :  { %623 = vmatpush3.msra.mxu0 %v280_v42 }
 0x106   :  { %v181_v36 = vpop.f32.mrf.mxu0 }
 0x107   :  { %v182_v37 = vadd.f32 %v485_v35, %v181_v36 }
 0x108   :  { %v556_v38 = vpop.f32.mrf.mxu0 }
 0x109   :  { %v185_v39 = vmax.f32 %v182_v37, 0.0 }
 0x10b   :  { %590 = vmatmul.mubr.f32.vlgmr.msra.gmra.mxu1 %v185_v39 }
 0x10c   :  { %659 = vmatprep.mubr.msk.f32.mxu1 %vm808_vm0, %v807_v0  ;;  %628 = vmatpush3.msra.mxu1 %v389_v43 }
 0x10d   :  { %629 = vmatprep.subr.mxu1 %v807_v0 }
 0x10e   :  { %630 = vmatpush3.msra.mxu1 %v388_v44 }
 0x10f   :  { %631 = vmatprep.subr.mxu1 %v807_v0 }
 0x110   :  { %632 = vmatpush3.msra.mxu1 %v387_v45 }
 0x111   :  { %633 = vmatprep.subr.mxu1 %v807_v0 }
 0x112   :  { %634 = vmatpush3.msra.mxu1 %v386_v46 }
 0x113   :  { %635 = vmatprep.subr.mxu1 %v807_v0 }
 0x114   :  { %636 = vmatpush3.msra.mxu1 %v385_v47 }
 0x115   :  { %637 = vmatprep.subr.mxu1 %v807_v0 }
 0x116   :  { %638 = vmatpush3.msra.mxu1 %v384_v48 }
 0x117   :  { %639 = vmatprep.subr.mxu1 %v807_v0 }
 0x118   :  { %640 = vmatpush3.msra.mxu1 %v383_v49 }
 0x119   :  { %641 = vmatprep.subr.mxu1 %v807_v0 }
 0x11a   :  { %642 = vmatpush3.msra.mxu1 %v382_v50 }
 0x11b   :  { %643 = vmatprep.subr.mxu1 %v807_v0 }
 0x11c   :  { %644 = vmatpush3.msra.mxu1 %v381_v51 }
 0x11d   :  { %645 = vmatprep.subr.mxu1 %v807_v0 }
 0x11e   :  { %646 = vmatpush3.msra.mxu1 %v380_v52 }
 0x11f   :  { %647 = vmatprep.subr.mxu1 %v807_v0 }
 0x120   :  { %648 = vmatpush3.msra.mxu1 %v379_v53 }
 0x121   :  { %649 = vmatprep.subr.mxu1 %v807_v0 }
 0x122   :  { %650 = vmatpush3.msra.mxu1 %v378_v54 }
 0x123   :  { %651 = vmatprep.subr.mxu1 %v807_v0 }
 0x124   :  { %652 = vmatpush3.msra.mxu1 %v377_v55 }
 0x125   :  { %653 = vmatprep.subr.mxu1 %v807_v0 }
 0x126   :  { %654 = vmatpush3.msra.mxu1 %v376_v61 }
 0x127   :  { %655 = vmatprep.subr.mxu1 %v807_v0 }
 0x128   :  { %656 = vmatpush3.msra.mxu1 %v375_v62 }
 0x129   :  { %657 = vmatprep.subr.mxu1 %v807_v0 }
 0x12a   :  { %658 = vmatpush3.msra.mxu1 %v374_v63 }
 0x1cb   :  { %v275_v57 = vpop.f32.mrf.mxu1 }
 0x1cc   :  { %v276_v58 = vadd.f32 %v487_v56, %v275_v57 }
 0x1cd   :  { %v591_v59 = vpop.f32.mrf.mxu1 }
 0x1ce   :  { %v279_v60 = vmax.f32 %v276_v58, 0.0 }
 0x1d0   :  { %625 = vmatmul.mubr.f32.vlgmr.msra.gmra.mxu0 %v279_v60 }
 0x290   :  { %v369_v2 = vpop.f32.mrf.mxu0 }
 0x291   :  { %v370_v3 = vadd.f32 %v488_v1, %v369_v2 }
 0x292   :  { %v626_v4 = vpop.f32.mrf.mxu0 }
 0x293   :  { %v373_v5 = vmax.f32 %v370_v3, 0.0 }
 0x295   :  { %660 = vmatmul.mubr.f32.vlgmr.msra.gmra.mxu1 %v373_v5 }
 0x355   :  { %v463_v7 = vpop.f32.mrf.mxu1 }
 0x356   :  { %v464_v8 = vadd.f32 %v489_v6, %v463_v7 }
 0x357   :  { %v661_v0 = vpop.f32.mrf.mxu1 }
 0x358   :  { %467 = vst [vmem:[#allocation11] sm:$0xff] %v464_v8 }
 0x359   :  { %783 = shalt.err (!%p780_p1)
}
 0x35a   :  { %477 = dma.vmem_to_hbm [thread:$0]  %s475_s17, 128, %s971_s9, [#allocation4]  }
 0x35b   :  { %798 = dma.done.wait [#allocation4], 128  }
 0x35c   :  { %799 = vsyncadd [#allocation4], 4294967168 }
 0x35d   :  { %481 = vsyncpa [#allocation3], 1 }
 0x35e   :  { %482 = vsyncpa [#allocation6], 1 }
 0x35f   :  { %483 = vsyncpa [#allocation9], 1 }
 0x360   :  { %484 = vsyncpa [#allocation4], 1 }

</bundles_post_ra>
